<compile_context>
chip_gen: v7x
topology: tpu7x:2x2x1
jax: 0.10.0
libtpu: 0.0.40
codegen_flags: <defaults>
</compile_context>

<pallas_src>
import functools

import jax
import jax.numpy as jnp
from jax.experimental import pallas as pl
from jax.experimental.pallas import tpu as pltpu

LN_EPS = 1e-5
LANE = 128


def _round_up(n, m):
    return ((n + m - 1) // m) * m


def _layer_norm(h, gamma, beta):
    # Single-pass statistics: var = E[h^2] - mean^2 (saves one full-tile VPU pass).
    mean = jnp.mean(h, axis=-1, keepdims=True)
    msq = jnp.mean(h * h, axis=-1, keepdims=True)
    var = msq - mean * mean
    inv = jax.lax.rsqrt(var + LN_EPS)  # EUP slot
    return (h - mean) * inv * gamma + beta


def base_qnetwork_kernel(
    x_ref,
    we_ref, be_ref,                      # shared encoder
    w1_ref, b1_ref, g1_ref, bt1_ref,     # linear1 + layernorm1
    w2_ref, b2_ref, g2_ref, bt2_ref,     # linear2 + layernorm2
    w3_ref, b3_ref,                      # output linear (columns padded to 128)
    out_ref,
    *,
    use_bf16_matmul,
):
    # Bind small params to locals once (no repeated broadcast materialization).
    be = be_ref[...]
    b1 = b1_ref[...]
    g1 = g1_ref[...]
    bt1 = bt1_ref[...]
    b2 = b2_ref[...]
    g2 = g2_ref[...]
    bt2 = bt2_ref[...]
    b3 = b3_ref[...]

    def mm(a, w_ref):
        w = w_ref[...]
        if use_bf16_matmul:
            # bf16 MXU inputs, f32 accumulation; all elementwise math stays f32
            # (safe on v5e which has no bf16 VPU/EUP).
            a = a.astype(jnp.bfloat16)
            w = w.astype(jnp.bfloat16)
        return jnp.dot(a, w, preferred_element_type=jnp.float32)

    x = x_ref[...].astype(jnp.float32)

    # --- SharedEncoder: ReLU(Linear) ---
    h = jnp.maximum(mm(x, we_ref) + be, 0.0)

    # --- Block 1: Linear -> LayerNorm -> ReLU -> Dropout(eval: identity) ---
    h1 = mm(h, w1_ref) + b1
    h1 = jnp.maximum(_layer_norm(h1, g1, bt1), 0.0)
    # TODO(synk): nn.Dropout(0.1) is identity in eval mode; training-mode RNG mask not implemented.

    # --- Block 2: Linear -> LayerNorm -> ReLU -> Dropout(eval: identity) ---
    h2 = mm(h1, w2_ref) + b2
    h2 = jnp.maximum(_layer_norm(h2, g2, bt2), 0.0)

    # --- Output Linear (lane-dense: padded to 128 columns) ---
    out_ref[...] = (mm(h2, w3_ref) + b3).astype(out_ref.dtype)


def base_qnetwork_forward(x, params, *, tile_batch=256, use_bf16_matmul=False):
    """x: (batch, input_dim) or (input_dim,) f32.  Returns (batch, output_dim) or (output_dim,)."""
    squeeze = x.ndim == 1
    if squeeze:
        x = x[None, :]

    batch, input_dim = x.shape
    hidden = params["we"].shape[1]
    output_dim = params["w3"].shape[1]

    # --- lane-dense output: pad output columns up to a multiple of 128 (zeros) ---
    out_pad = _round_up(max(output_dim, LANE), LANE)
    w3p = jnp.zeros((hidden, out_pad), jnp.float32).at[:, :output_dim].set(params["w3"])
    b3p = jnp.zeros((1, out_pad), jnp.float32).at[:, :output_dim].set(params["b3"])

    # --- batch tiling: TB multiple of 8, capped (fits v7x 64 MiB VMEM easily) ---
    tb = min(_round_up(tile_batch, 8), _round_up(batch, 8))
    padded_batch = _round_up(batch, tb)
    if padded_batch != batch:
        x = jnp.pad(x, ((0, padded_batch - batch), (0, 0)))
    num_tiles = padded_batch // tb

    operands = (
        x,
        params["we"], params["be"],
        params["w1"], params["b1"], params["g1"], params["bt1"],
        params["w2"], params["b2"], params["g2"], params["bt2"],
        w3p, b3p,
    )

    # x is tiled over the batch grid axis; every weight/bias maps to the constant
    # (0, 0) block so it is loaded once and stays VMEM-resident across tiles.
    def const_spec(arr):
        return pl.BlockSpec(arr.shape, lambda i: (0, 0))

    in_specs = [pl.BlockSpec((tb, input_dim), lambda i: (i, 0))]
    in_specs += [const_spec(a) for a in operands[1:]]
    out_spec = pl.BlockSpec((tb, out_pad), lambda i: (i, 0))

    flops = 2 * padded_batch * (
        input_dim * hidden + hidden * hidden + hidden * hidden + hidden * out_pad
    )
    bytes_accessed = sum(a.size * a.dtype.itemsize for a in operands)
    bytes_accessed += padded_batch * out_pad * 4
    cost = pl.CostEstimate(
        flops=flops,
        transcendentals=2 * padded_batch,  # one rsqrt per row per LayerNorm
        bytes_accessed=bytes_accessed,
    )

    out = pl.pallas_call(
        functools.partial(base_qnetwork_kernel, use_bf16_matmul=use_bf16_matmul),
        out_shape=jax.ShapeDtypeStruct((padded_batch, out_pad), jnp.float32),
        grid=(num_tiles,),
        in_specs=in_specs,
        out_specs=out_spec,
        compiler_params=pltpu.CompilerParams(
            dimension_semantics=("parallel",),  # megacore on v7x; no-op on v5e/v6e
        ),
        cost_estimate=cost,
    )(*operands)

    out = out[:batch, :output_dim]
    if squeeze:
        out = out[0]
    return out


def xavier_uniform(key, fan_in, fan_out):
    bound = jnp.sqrt(6.0 / (fan_in + fan_out))
    # stored as (in, out): kernel computes x @ W
    return jax.random.uniform(key, (fan_in, fan_out), jnp.float32, -bound, bound)


def make_params(key, input_dim, hidden_size, output_dim):
    ks = jax.random.split(key, 4)
    return {
        # SharedEncoder (deterministic synthetic weights, not a checkpoint load)
        "we": xavier_uniform(ks[0], input_dim, hidden_size),
        "be": jnp.zeros((1, hidden_size), jnp.float32),
        # Q-network linears (xavier_uniform_, bias=0 as in _initialize_weights)
        "w1": xavier_uniform(ks[1], hidden_size, hidden_size),
        "b1": jnp.zeros((1, hidden_size), jnp.float32),
        "g1": jnp.ones((1, hidden_size), jnp.float32),    # LayerNorm weight
        "bt1": jnp.zeros((1, hidden_size), jnp.float32),  # LayerNorm bias
        "w2": xavier_uniform(ks[2], hidden_size, hidden_size),
        "b2": jnp.zeros((1, hidden_size), jnp.float32),
        "g2": jnp.ones((1, hidden_size), jnp.float32),
        "bt2": jnp.zeros((1, hidden_size), jnp.float32),
        "w3": xavier_uniform(ks[3], hidden_size, output_dim),
        "b3": jnp.zeros((1, output_dim), jnp.float32),
    }


def reference_forward(x, p):
    h = jnp.maximum(x @ p["we"] + p["be"], 0.0)
    h1 = h @ p["w1"] + p["b1"]
    h1 = jnp.maximum(_layer_norm(h1, p["g1"], p["bt1"]), 0.0)
    h2 = h1 @ p["w2"] + p["b2"]
    h2 = jnp.maximum(_layer_norm(h2, p["g2"], p["bt2"]), 0.0)
    return h2 @ p["w3"] + p["b3"]


if __name__ == "__main__":
    input_dim, hidden_size, output_dim, batch = 8, 64, 4, 2
    key = jax.random.PRNGKey(0)
    kx, kp = jax.random.split(key)
    x = jax.random.normal(kx, (batch, input_dim), jnp.float32)
    params = make_params(kp, input_dim, hidden_size, output_dim)

    out = base_qnetwork_forward(x, params)
    out = jax.block_until_ready(out)

    ref = reference_forward(x, params)
    assert out.shape == (batch, output_dim), out.shape
    assert jnp.allclose(out, ref, atol=1e-4, rtol=1e-4), (out, ref)

    # also exercise the 1-D (single sample) path like the PyTorch forward
    out1 = jax.block_until_ready(base_qnetwork_forward(x[0], params))
    assert out1.shape == (output_dim,)
    assert jnp.allclose(out1, ref[0], atol=1e-4, rtol=1e-4)

    print("KERNEL_OK")
</pallas_src>

<mosaic_0001>
module attributes {stable_mosaic.version = 11 : i64} {
  func.func @base_qnetwork_kernel(%arg0: i32, %arg1: memref<8x8xf32, #tpu.memory_space<vmem>>, %arg2: memref<8x64xf32, #tpu.memory_space<vmem>>, %arg3: memref<1x64xf32, #tpu.memory_space<vmem>>, %arg4: memref<64x64xf32, #tpu.memory_space<vmem>>, %arg5: memref<1x64xf32, #tpu.memory_space<vmem>>, %arg6: memref<1x64xf32, #tpu.memory_space<vmem>>, %arg7: memref<1x64xf32, #tpu.memory_space<vmem>>, %arg8: memref<64x64xf32, #tpu.memory_space<vmem>>, %arg9: memref<1x64xf32, #tpu.memory_space<vmem>>, %arg10: memref<1x64xf32, #tpu.memory_space<vmem>>, %arg11: memref<1x64xf32, #tpu.memory_space<vmem>>, %arg12: memref<64x128xf32, #tpu.memory_space<vmem>>, %arg13: memref<1x128xf32, #tpu.memory_space<vmem>>, %arg14: memref<8x128xf32, #tpu.memory_space<vmem>>) attributes {dimension_semantics = [#tpu.dimension_semantics<parallel>], iteration_bounds = array<i64: 1>, scalar_prefetch = 0 : i64, scratch_operands = 0 : i64, tpu.core_type = #tpu.core_type<tc>, window_params = [{transform_indices = @transform_0, window_bounds = array<i64: 8, 8>}, {pipeline_mode = #tpu.pipeline_mode<synchronous>, transform_indices = @transform_1, window_bounds = array<i64: 8, 64>}, {pipeline_mode = #tpu.pipeline_mode<synchronous>, transform_indices = @transform_2, window_bounds = array<i64: 1, 64>}, {pipeline_mode = #tpu.pipeline_mode<synchronous>, transform_indices = @transform_3, window_bounds = array<i64: 64, 64>}, {pipeline_mode = #tpu.pipeline_mode<synchronous>, transform_indices = @transform_4, window_bounds = array<i64: 1, 64>}, {pipeline_mode = #tpu.pipeline_mode<synchronous>, transform_indices = @transform_5, window_bounds = array<i64: 1, 64>}, {pipeline_mode = #tpu.pipeline_mode<synchronous>, transform_indices = @transform_6, window_bounds = array<i64: 1, 64>}, {pipeline_mode = #tpu.pipeline_mode<synchronous>, transform_indices = @transform_7, window_bounds = array<i64: 64, 64>}, {pipeline_mode = #tpu.pipeline_mode<synchronous>, transform_indices = @transform_8, window_bounds = array<i64: 1, 64>}, {pipeline_mode = #tpu.pipeline_mode<synchronous>, transform_indices = @transform_9, window_bounds = array<i64: 1, 64>}, {pipeline_mode = #tpu.pipeline_mode<synchronous>, transform_indices = @transform_10, window_bounds = array<i64: 1, 64>}, {pipeline_mode = #tpu.pipeline_mode<synchronous>, transform_indices = @transform_11, window_bounds = array<i64: 64, 128>}, {pipeline_mode = #tpu.pipeline_mode<synchronous>, transform_indices = @transform_12, window_bounds = array<i64: 1, 128>}, {transform_indices = @transform_13, window_bounds = array<i64: 8, 128>}]} {
    %c0 = arith.constant 0 : index
    %c0_0 = arith.constant 0 : index
    %0 = vector.load %arg3[%c0, %c0_0] : memref<1x64xf32, #tpu.memory_space<vmem>>, vector<1x64xf32>
    %c0_1 = arith.constant 0 : index
    %c0_2 = arith.constant 0 : index
    %1 = vector.load %arg5[%c0_1, %c0_2] : memref<1x64xf32, #tpu.memory_space<vmem>>, vector<1x64xf32>
    %c0_3 = arith.constant 0 : index
    %c0_4 = arith.constant 0 : index
    %2 = vector.load %arg6[%c0_3, %c0_4] : memref<1x64xf32, #tpu.memory_space<vmem>>, vector<1x64xf32>
    %c0_5 = arith.constant 0 : index
    %c0_6 = arith.constant 0 : index
    %3 = vector.load %arg7[%c0_5, %c0_6] : memref<1x64xf32, #tpu.memory_space<vmem>>, vector<1x64xf32>
    %c0_7 = arith.constant 0 : index
    %c0_8 = arith.constant 0 : index
    %4 = vector.load %arg9[%c0_7, %c0_8] : memref<1x64xf32, #tpu.memory_space<vmem>>, vector<1x64xf32>
    %c0_9 = arith.constant 0 : index
    %c0_10 = arith.constant 0 : index
    %5 = vector.load %arg10[%c0_9, %c0_10] : memref<1x64xf32, #tpu.memory_space<vmem>>, vector<1x64xf32>
    %c0_11 = arith.constant 0 : index
    %c0_12 = arith.constant 0 : index
    %6 = vector.load %arg11[%c0_11, %c0_12] : memref<1x64xf32, #tpu.memory_space<vmem>>, vector<1x64xf32>
    %c0_13 = arith.constant 0 : index
    %c0_14 = arith.constant 0 : index
    %7 = vector.load %arg13[%c0_13, %c0_14] : memref<1x128xf32, #tpu.memory_space<vmem>>, vector<1x128xf32>
    %c0_15 = arith.constant 0 : index
    %c0_16 = arith.constant 0 : index
    %8 = vector.load %arg1[%c0_15, %c0_16] : memref<8x8xf32, #tpu.memory_space<vmem>>, vector<8x8xf32>
    %c0_17 = arith.constant 0 : index
    %c0_18 = arith.constant 0 : index
    %9 = vector.load %arg2[%c0_17, %c0_18] : memref<8x64xf32, #tpu.memory_space<vmem>>, vector<8x64xf32>
    %cst = arith.constant dense<0.000000e+00> : vector<8x64xf32>
    %10 = tpu.matmul %8, %9, %cst {dimension_numbers = #tpu.dot_dimension_numbers<[1], [0], [0], [1], [0, 0, 1, 1], [], []>} : vector<8x8xf32>, vector<8x64xf32>, vector<8x64xf32> -> vector<8x64xf32>
    %11 = vector.broadcast %0 : vector<1x64xf32> to vector<8x64xf32>
    %12 = arith.addf %10, %11 : vector<8x64xf32>
    %cst_19 = arith.constant 0.000000e+00 : f32
    %13 = vector.broadcast %cst_19 : f32 to vector<8x64xf32>
    %14 = arith.maximumf %12, %13 : vector<8x64xf32>
    %c0_20 = arith.constant 0 : index
    %c0_21 = arith.constant 0 : index
    %15 = vector.load %arg4[%c0_20, %c0_21] : memref<64x64xf32, #tpu.memory_space<vmem>>, vector<64x64xf32>
    %cst_22 = arith.constant dense<0.000000e+00> : vector<8x64xf32>
    %16 = tpu.matmul %14, %15, %cst_22 {dimension_numbers = #tpu.dot_dimension_numbers<[1], [0], [0], [1], [0, 0, 1, 1], [], []>} : vector<8x64xf32>, vector<64x64xf32>, vector<8x64xf32> -> vector<8x64xf32>
    %17 = vector.broadcast %1 : vector<1x64xf32> to vector<8x64xf32>
    %18 = arith.addf %16, %17 : vector<8x64xf32>
    %cst_23 = arith.constant dense<0.000000e+00> : vector<8xf32>
    %19 = vector.multi_reduction <add>, %18, %cst_23 [1] : vector<8x64xf32> to vector<8xf32>
    %20 = vector.shape_cast %19 : vector<8xf32> to vector<8x1xf32>
    %cst_24 = arith.constant 6.400000e+01 : f32
    %21 = vector.broadcast %cst_24 : f32 to vector<8x1xf32>
    %22 = arith.divf %20, %21 : vector<8x1xf32>
    %23 = arith.mulf %18, %18 : vector<8x64xf32>
    %cst_25 = arith.constant dense<0.000000e+00> : vector<8xf32>
    %24 = vector.multi_reduction <add>, %23, %cst_25 [1] : vector<8x64xf32> to vector<8xf32>
    %25 = vector.shape_cast %24 : vector<8xf32> to vector<8x1xf32>
    %cst_26 = arith.constant 6.400000e+01 : f32
    %26 = vector.broadcast %cst_26 : f32 to vector<8x1xf32>
    %27 = arith.divf %25, %26 : vector<8x1xf32>
    %28 = arith.mulf %22, %22 : vector<8x1xf32>
    %29 = arith.subf %27, %28 : vector<8x1xf32>
    %cst_27 = arith.constant 9.99999974E-6 : f32
    %30 = vector.broadcast %cst_27 : f32 to vector<8x1xf32>
    %31 = arith.addf %29, %30 : vector<8x1xf32>
    %32 = math.rsqrt %31 : vector<8x1xf32>
    %33 = vector.broadcast %22 : vector<8x1xf32> to vector<8x64xf32>
    %34 = arith.subf %18, %33 : vector<8x64xf32>
    %35 = vector.broadcast %32 : vector<8x1xf32> to vector<8x64xf32>
    %36 = arith.mulf %34, %35 : vector<8x64xf32>
    %37 = vector.broadcast %2 : vector<1x64xf32> to vector<8x64xf32>
    %38 = arith.mulf %36, %37 : vector<8x64xf32>
    %39 = vector.broadcast %3 : vector<1x64xf32> to vector<8x64xf32>
    %40 = arith.addf %38, %39 : vector<8x64xf32>
    %cst_28 = arith.constant 0.000000e+00 : f32
    %41 = vector.broadcast %cst_28 : f32 to vector<8x64xf32>
    %42 = arith.maximumf %40, %41 : vector<8x64xf32>
    %c0_29 = arith.constant 0 : index
    %c0_30 = arith.constant 0 : index
    %43 = vector.load %arg8[%c0_29, %c0_30] : memref<64x64xf32, #tpu.memory_space<vmem>>, vector<64x64xf32>
    %cst_31 = arith.constant dense<0.000000e+00> : vector<8x64xf32>
    %44 = tpu.matmul %42, %43, %cst_31 {dimension_numbers = #tpu.dot_dimension_numbers<[1], [0], [0], [1], [0, 0, 1, 1], [], []>} : vector<8x64xf32>, vector<64x64xf32>, vector<8x64xf32> -> vector<8x64xf32>
    %45 = vector.broadcast %4 : vector<1x64xf32> to vector<8x64xf32>
    %46 = arith.addf %44, %45 : vector<8x64xf32>
    %cst_32 = arith.constant dense<0.000000e+00> : vector<8xf32>
    %47 = vector.multi_reduction <add>, %46, %cst_32 [1] : vector<8x64xf32> to vector<8xf32>
    %48 = vector.shape_cast %47 : vector<8xf32> to vector<8x1xf32>
    %cst_33 = arith.constant 6.400000e+01 : f32
    %49 = vector.broadcast %cst_33 : f32 to vector<8x1xf32>
    %50 = arith.divf %48, %49 : vector<8x1xf32>
    %51 = arith.mulf %46, %46 : vector<8x64xf32>
    %cst_34 = arith.constant dense<0.000000e+00> : vector<8xf32>
    %52 = vector.multi_reduction <add>, %51, %cst_34 [1] : vector<8x64xf32> to vector<8xf32>
    %53 = vector.shape_cast %52 : vector<8xf32> to vector<8x1xf32>
    %cst_35 = arith.constant 6.400000e+01 : f32
    %54 = vector.broadcast %cst_35 : f32 to vector<8x1xf32>
    %55 = arith.divf %53, %54 : vector<8x1xf32>
    %56 = arith.mulf %50, %50 : vector<8x1xf32>
    %57 = arith.subf %55, %56 : vector<8x1xf32>
    %cst_36 = arith.constant 9.99999974E-6 : f32
    %58 = vector.broadcast %cst_36 : f32 to vector<8x1xf32>
    %59 = arith.addf %57, %58 : vector<8x1xf32>
    %60 = math.rsqrt %59 : vector<8x1xf32>
    %61 = vector.broadcast %50 : vector<8x1xf32> to vector<8x64xf32>
    %62 = arith.subf %46, %61 : vector<8x64xf32>
    %63 = vector.broadcast %60 : vector<8x1xf32> to vector<8x64xf32>
    %64 = arith.mulf %62, %63 : vector<8x64xf32>
    %65 = vector.broadcast %5 : vector<1x64xf32> to vector<8x64xf32>
    %66 = arith.mulf %64, %65 : vector<8x64xf32>
    %67 = vector.broadcast %6 : vector<1x64xf32> to vector<8x64xf32>
    %68 = arith.addf %66, %67 : vector<8x64xf32>
    %cst_37 = arith.constant 0.000000e+00 : f32
    %69 = vector.broadcast %cst_37 : f32 to vector<8x64xf32>
    %70 = arith.maximumf %68, %69 : vector<8x64xf32>
    %c0_38 = arith.constant 0 : index
    %c0_39 = arith.constant 0 : index
    %71 = vector.load %arg12[%c0_38, %c0_39] : memref<64x128xf32, #tpu.memory_space<vmem>>, vector<64x128xf32>
    %cst_40 = arith.constant dense<0.000000e+00> : vector<8x128xf32>
    %72 = tpu.matmul %70, %71, %cst_40 {dimension_numbers = #tpu.dot_dimension_numbers<[1], [0], [0], [1], [0, 0, 1, 1], [], []>} : vector<8x64xf32>, vector<64x128xf32>, vector<8x128xf32> -> vector<8x128xf32>
    %73 = vector.broadcast %7 : vector<1x128xf32> to vector<8x128xf32>
    %74 = arith.addf %72, %73 : vector<8x128xf32>
    %c0_41 = arith.constant 0 : index
    %c0_42 = arith.constant 0 : index
    %75 = vector.load %arg14[%c0_41, %c0_42] : memref<8x128xf32, #tpu.memory_space<vmem>>, vector<8x128xf32>
    tpu.vector_store %arg14[%c0_41, %c0_42], %74 {strides = array<i32>} : memref<8x128xf32, #tpu.memory_space<vmem>>, vector<8x128xf32>,
    return
  }
  func.func @transform_0(%arg0: i32) -> (i32, i32) {
    %c0_i32 = arith.constant 0 : i32
    %c0_i32_0 = arith.constant 0 : i32
    return %arg0, %c0_i32 : i32, i32
  }
  func.func @transform_1(%arg0: i32) -> (i32, i32) {
    %c0_i32 = arith.constant 0 : i32
    %c0_i32_0 = arith.constant 0 : i32
    %c0_i32_1 = arith.constant 0 : i32
    return %c0_i32, %c0_i32_0 : i32, i32
  }
  func.func @transform_2(%arg0: i32) -> (i32, i32) {
    %c0_i32 = arith.constant 0 : i32
    %c0_i32_0 = arith.constant 0 : i32
    %c0_i32_1 = arith.constant 0 : i32
    return %c0_i32, %c0_i32_0 : i32, i32
  }
  func.func @transform_3(%arg0: i32) -> (i32, i32) {
    %c0_i32 = arith.constant 0 : i32
    %c0_i32_0 = arith.constant 0 : i32
    %c0_i32_1 = arith.constant 0 : i32
    return %c0_i32, %c0_i32_0 : i32, i32
  }
  func.func @transform_4(%arg0: i32) -> (i32, i32) {
    %c0_i32 = arith.constant 0 : i32
    %c0_i32_0 = arith.constant 0 : i32
    %c0_i32_1 = arith.constant 0 : i32
    return %c0_i32, %c0_i32_0 : i32, i32
  }
  func.func @transform_5(%arg0: i32) -> (i32, i32) {
    %c0_i32 = arith.constant 0 : i32
    %c0_i32_0 = arith.constant 0 : i32
    %c0_i32_1 = arith.constant 0 : i32
    return %c0_i32, %c0_i32_0 : i32, i32
  }
  func.func @transform_6(%arg0: i32) -> (i32, i32) {
    %c0_i32 = arith.constant 0 : i32
    %c0_i32_0 = arith.constant 0 : i32
    %c0_i32_1 = arith.constant 0 : i32
    return %c0_i32, %c0_i32_0 : i32, i32
  }
  func.func @transform_7(%arg0: i32) -> (i32, i32) {
    %c0_i32 = arith.constant 0 : i32
    %c0_i32_0 = arith.constant 0 : i32
    %c0_i32_1 = arith.constant 0 : i32
    return %c0_i32, %c0_i32_0 : i32, i32
  }
  func.func @transform_8(%arg0: i32) -> (i32, i32) {
    %c0_i32 = arith.constant 0 : i32
    %c0_i32_0 = arith.constant 0 : i32
    %c0_i32_1 = arith.constant 0 : i32
    return %c0_i32, %c0_i32_0 : i32, i32
  }
  func.func @transform_9(%arg0: i32) -> (i32, i32) {
    %c0_i32 = arith.constant 0 : i32
    %c0_i32_0 = arith.constant 0 : i32
    %c0_i32_1 = arith.constant 0 : i32
    return %c0_i32, %c0_i32_0 : i32, i32
  }
  func.func @transform_10(%arg0: i32) -> (i32, i32) {
    %c0_i32 = arith.constant 0 : i32
    %c0_i32_0 = arith.constant 0 : i32
    %c0_i32_1 = arith.constant 0 : i32
    return %c0_i32, %c0_i32_0 : i32, i32
  }
  func.func @transform_11(%arg0: i32) -> (i32, i32) {
    %c0_i32 = arith.constant 0 : i32
    %c0_i32_0 = arith.constant 0 : i32
    %c0_i32_1 = arith.constant 0 : i32
    return %c0_i32, %c0_i32_0 : i32, i32
  }
  func.func @transform_12(%arg0: i32) -> (i32, i32) {
    %c0_i32 = arith.constant 0 : i32
    %c0_i32_0 = arith.constant 0 : i32
    %c0_i32_1 = arith.constant 0 : i32
    return %c0_i32, %c0_i32_0 : i32, i32
  }
  func.func @transform_13(%arg0: i32) -> (i32, i32) {
    %c0_i32 = arith.constant 0 : i32
    %c0_i32_0 = arith.constant 0 : i32
    return %arg0, %c0_i32 : i32, i32
  }
}

</mosaic_0001>

<bundles_post_ra>
// kernel: tpu_custom_call.1
= control target key start
LH: loop header
LB: loop body
LE: loop exit
PB: predicated region body
PF: predicated region fallthrough
CT: control target
= control target key end

     0   :  { %18 = vsyncpa [#allocation3], 0  ;;  %s1044_s0 = inlined_call_operand.hbm [shape: f32[8,8], index: 0, kind: input, shape index: {}]   ;;  %s1045_s1 = inlined_call_operand.hbm [shape: f32[8,64], index: 1, kind: input, shape index: {}]   ;;  %s1046_s2 = inlined_call_operand.vmem [shape: f32[1,64], index: 2, kind: input, shape index: {}]   ;;  %s1047_s3 = inlined_call_operand.hbm [shape: f32[64,64], index: 3, kind: input, shape index: {}]   ;;  %s1048_s4 = inlined_call_operand.vmem [shape: f32[1,64], index: 4, kind: input, shape index: {}]   ;;  %s1049_s5 = inlined_call_operand.vmem [shape: f32[1,64], index: 5, kind: input, shape index: {}]   ;;  %s1050_s6 = inlined_call_operand.vmem [shape: f32[1,64], index: 6, kind: input, shape index: {}]   ;;  %s1051_s7 = inlined_call_operand.hbm [shape: f32[64,64], index: 7, kind: input, shape index: {}]   ;;  %s1052_s8 = inlined_call_operand.vmem [shape: f32[1,64], index: 8, kind: input, shape index: {}]   ;;  %s1053_s9 = inlined_call_operand.vmem [shape: f32[1,64], index: 9, kind: input, shape index: {}]   ;;  %s1054_s10 = inlined_call_operand.vmem [shape: f32[1,64], index: 10, kind: input, shape index: {}]   ;;  %s1055_s11 = inlined_call_operand.hbm [shape: f32[64,128], index: 11, kind: input, shape index: {}]   ;;  %s1056_s12 = inlined_call_operand.vmem [shape: f32[1,128], index: 12, kind: input, shape index: {}]   ;;  %s1057_s13 = inlined_call_operand.hbm [shape: f32[8,128], index: 13, kind: output, shape index: {}]  }
   0x1   :  { %19 = vsyncpa [#allocation6], 0 }
   0x2   :  { %20 = vsyncpa [#allocation9], 0 }
   0x3   :  { %21 = vsyncpa [#allocation4], 0  ;;  %s835_s25 = smov [#allocation5]   ;;  %s695_s29 = scalar_lea.hbm %s1045_s1, 128 }
   0x4   :  { %s38_s26 = sshll.u32 %s835_s25, 4  ;;  %p696_p0 = scmp.ne.s32.totalorder %s1045_s1, %s695_s29  ;;  %s39_s26 = int_to_ptr.vmem [resolvable:$true] %s38_s26 }
   0x5   :  { %p699_p1 = scmp.lt.u32.totalorder %s695_s29, %s1045_s1 }
   0x7   :  { %p701_p2 = pnand %p699_p1, %p696_p0 }
   0x9   :  { %704 = shalt.err (!%p701_p2)
}
   0xa   :  { %s705_s17 = scalar_lea.vmem %s39_s26, 128  ;;  %p710_p4 = scmp.lt.s32.totalorder %s39_s26, %s39_s26 }
   0xb   :  { %p706_p3 = scmp.ne.s32.totalorder %s39_s26, %s705_s17  ;;  %p711_p5 = scmp.lt.s32.totalorder %s705_s17, %s705_s17 }
   0xd   :  { %p712_p6 = por %p711_p5, %p710_p4 }
   0xf   :  { %p713_p7 = pnand %p712_p6, %p706_p3 }
  0x11   :  { %716 = shalt.err (!%p713_p7)
}
  0x12   :  { %41 = dma.hbm_to_vmem [thread:$0]  %s1045_s1, 128, %s39_s26, [#allocation6]  }
  0x13   :  { %s836_s20 = smov [#allocation8]   ;;  %s837_s22 = smov [#allocation2]  }
  0x14   :  { %s67_s21 = sshll.u32 %s836_s20, 4  ;;  %s28_s23 = sshll.u32 %s837_s22, 4  ;;  %s68_s21 = int_to_ptr.vmem [resolvable:$true] %s67_s21  ;;  %s29_s23 = int_to_ptr.vmem [resolvable:$true] %s28_s23 }
  0x15   :  { %s717_s27 = scalar_lea.hbm %s1051_s7, 1024 }
  0x16   :  { %p718_p8 = scmp.ne.s32.totalorder %s1051_s7, %s717_s27  ;;  %p721_p9 = scmp.lt.u32.totalorder %s717_s27, %s1051_s7 }
  0x18   :  { %p723_p10 = pnand %p721_p9, %p718_p8 }
  0x1a   :  { %726 = shalt.err (!%p723_p10)
}
  0x1b   :  { %s727_s1 = scalar_lea.vmem %s68_s21, 1024  ;;  %p732_p12 = scmp.lt.s32.totalorder %s68_s21, %s68_s21 }
  0x1c   :  { %p728_p11 = scmp.ne.s32.totalorder %s68_s21, %s727_s1  ;;  %p733_p13 = scmp.lt.s32.totalorder %s727_s1, %s727_s1 }
  0x1e   :  { %p734_p0 = por %p733_p13, %p732_p12 }
  0x20   :  { %p735_p1 = pnand %p734_p0, %p728_p11 }
  0x22   :  { %738 = shalt.err (!%p735_p1)
}
  0x23   :  { %s838_s26 = smov 128   ;;  %s839_s15 = smov 8  }
  0x24   :  { %73 = dma.hbm_to_vmem [thread:$0]  %s1051_s7, 1024, %s68_s21, [#allocation9], %s838_s26, %s838_s26, %s839_s15  }
  0x25   :  { %s739_s20 = scalar_lea.hbm %s1044_s0, 128 }
  0x26   :  { %p740_p2 = scmp.ne.s32.totalorder %s1044_s0, %s739_s20  ;;  %p743_p3 = scmp.lt.u32.totalorder %s739_s20, %s1044_s0 }
  0x28   :  { %p745_p4 = pnand %p743_p3, %p740_p2 }
  0x2a   :  { %748 = shalt.err (!%p745_p4)
}
  0x2b   :  { %s749_s28 = scalar_lea.vmem %s29_s23, 128  ;;  %p754_p6 = scmp.lt.s32.totalorder %s29_s23, %s29_s23 }
  0x2c   :  { %p750_p5 = scmp.ne.s32.totalorder %s29_s23, %s749_s28  ;;  %p755_p7 = scmp.lt.s32.totalorder %s749_s28, %s749_s28 }
  0x2e   :  { %p756_p8 = por %p755_p7, %p754_p6 }
  0x30   :  { %p757_p9 = pnand %p756_p8, %p750_p5 }
  0x32   :  { %760 = shalt.err (!%p757_p9)
}
  0x33   :  { %31 = dma.hbm_to_vmem [thread:$0]  %s1044_s0, 128, %s29_s23, [#allocation3]  }
  0x34   :  { %s840_s29 = smov [#allocation7]   ;;  %s841_s14 = smov [#allocation10]  }
  0x35   :  { %s49_s30 = sshll.u32 %s840_s29, 4  ;;  %s85_s1 = sshll.u32 %s841_s14, 4  ;;  %s50_s30 = int_to_ptr.vmem [resolvable:$true] %s49_s30  ;;  %s86_s1 = int_to_ptr.vmem [resolvable:$true] %s85_s1 }
  0x36   :  { %s761_s18 = scalar_lea.hbm %s1047_s3, 1024 }
  0x37   :  { %p762_p10 = scmp.ne.s32.totalorder %s1047_s3, %s761_s18  ;;  %p765_p11 = scmp.lt.u32.totalorder %s761_s18, %s1047_s3 }
  0x39   :  { %p767_p12 = pnand %p765_p11, %p762_p10 }
  0x3b   :  { %770 = shalt.err (!%p767_p12)
}
  0x3c   :  { %s771_s0 = scalar_lea.vmem %s50_s30, 1024  ;;  %p776_p0 = scmp.lt.s32.totalorder %s50_s30, %s50_s30 }
  0x3d   :  { %p772_p13 = scmp.ne.s32.totalorder %s50_s30, %s771_s0  ;;  %p777_p1 = scmp.lt.s32.totalorder %s771_s0, %s771_s0 }
  0x3f   :  { %p778_p2 = por %p777_p1, %p776_p0 }
  0x41   :  { %p779_p3 = pnand %p778_p2, %p772_p13 }
  0x43   :  { %782 = shalt.err (!%p779_p3)
}
  0x44   :  { %55 = dma.hbm_to_vmem [thread:$0]  %s1047_s3, 1024, %s50_s30, [#allocation6], %s838_s26, %s838_s26, %s839_s15  }
  0x45   :  { %s783_s7 = scalar_lea.hbm %s1055_s11, 1024 }
  0x46   :  { %p784_p4 = scmp.ne.s32.totalorder %s1055_s11, %s783_s7  ;;  %p787_p5 = scmp.lt.u32.totalorder %s783_s7, %s1055_s11 }
  0x48   :  { %p789_p6 = pnand %p787_p5, %p784_p4 }
  0x4a   :  { %792 = shalt.err (!%p789_p6)
}
  0x4b   :  { %s793_s17 = scalar_lea.vmem %s86_s1, 1024  ;;  %p798_p8 = scmp.lt.s32.totalorder %s86_s1, %s86_s1 }
  0x4c   :  { %p794_p7 = scmp.ne.s32.totalorder %s86_s1, %s793_s17  ;;  %p799_p9 = scmp.lt.s32.totalorder %s793_s17, %s793_s17 }
  0x4e   :  { %p800_p10 = por %p799_p9, %p798_p8 }
  0x50   :  { %p801_p11 = pnand %p800_p10, %p794_p7 }
  0x52   :  { %804 = shalt.err (!%p801_p11)
}
  0x53   :  { %91 = dma.hbm_to_vmem [thread:$0]  %s1055_s11, 1024, %s86_s1, [#allocation9], %s838_s26, %s838_s26, %s839_s15  }
  0x54   :  { %827 = dma.done.wait [#allocation3], 128  }
  0x55   :  { %828 = vsyncadd [#allocation3], 4294967168 }
  0x56   :  { %829 = dma.done.wait [#allocation6], 1152  }
  0x57   :  { %830 = vsyncadd [#allocation6], 4294966144 }
  0x58   :  { %831 = dma.done.wait [#allocation9], 2048  }
  0x59   :  { %832 = vsyncadd [#allocation9], 4294965248  ;;  %v842_v0 = vmov 0.0   ;;  %vm843_vm0 = vmmov 0   ;;  %v844_v1 = vmov 0.0|0.0   ;;  %vm125_vm1 = vcmask 64512  }
  0x5a   :  { %582 = vmatprep.subr.mxu0 %v842_v0  ;;  %584 = vmatprep.mubr.msk.f32.mxu0 %vm843_vm0, %v842_v0  ;;  %v118_v2 = vld [vmem:[#allocation5] sm:$0xff]  ;;  %v117_v3 = vld [vmem:[#allocation2] sm:$0xff]  ;;  %v200_v4 = vld [vmem:[#allocation7] sm:$0xff]  ;;  %vm214_vm2 = vcmask 523264   ;;  %s845_s25 = smov [#allocation11]  }
  0x5b   :  { %644 = vmatprep.subr.bf16.mxu1 %v844_v1  ;;  %603 = vmatprep.mubr.msk.f32.mxu1 %vm843_vm0, %v842_v0  ;;  %v201_v5 = vld [vmem:[#allocation7 + $0x8] sm:$0xff]  ;;  %v202_v6 = vld [vmem:[#allocation7 + $0x10] sm:$0xff]  ;;  %v203_v7 = vld [vmem:[#allocation7 + $0x18] sm:$0xff]  ;;  %s530_s27 = sshll.u32 %s845_s25, 4  ;;  %s531_s27 = int_to_ptr.vmem [resolvable:$true] %s530_s27 }
  0x5c   :  { %583 = vmatpush3.msra.mxu0 %v118_v2  ;;  %v645_v8 = vpack.c.bf16 %v201_v5, %v200_v4  ;;  %v648_v9 = vpack.c.bf16 %v203_v7, %v202_v6  ;;  %v204_v10 = vld [vmem:[#allocation7 + $0x20] sm:$0xff]  ;;  %v205_v11 = vld [vmem:[#allocation7 + $0x28] sm:$0xff]  ;;  %v206_v13 = vld [vmem:[#allocation7 + $0x30] sm:$0xff]  ;;  %p810_p13 = scmp.lt.s32.totalorder %s531_s27, %s531_s27 }
  0x5d   :  { %585 = vmatmul.mubr.msk.f32.vlgmr.msra.gmra.mrb[0].mxu0 %vm125_vm1, %v117_v3  ;;  %656 = vmatprep.subr.bf16.mxu0 %v844_v1  ;;  %v651_v12 = vpack.c.bf16 %v205_v11, %v204_v10  ;;  %v207_v14 = vld [vmem:[#allocation7 + $0x38] sm:$0xff]  ;;  %v541_v16 = vld [vmem:[%s1046_s2] ss:$0 sm:$0xff]  ;;  %v319_v28 = vld [vmem:[#allocation8] sm:$0xff] }
  0x5e   :  { %622 = vmatprep.mubr.msk.f32.mxu0 %vm843_vm0, %v842_v0  ;;  %646 = vmatpush3.bf16.msra.mxu1 %v645_v8  ;;  %v654_v15 = vpack.c.bf16 %v207_v14, %v206_v13  ;;  %v543_v21 = vld [vmem:[%s1048_s4] ss:$0 sm:$0xff]  ;;  %v320_v29 = vld [vmem:[#allocation8 + $0x8] sm:$0xff]  ;;  %v322_v32 = vld [vmem:[#allocation8 + $0x18] sm:$0xff] }
  0x5f   :  { %647 = vmatprep.subr.bf16.mxu1 %v844_v1  ;;  %v657_v30 = vpack.c.bf16 %v320_v29, %v319_v28  ;;  %v321_v31 = vld [vmem:[#allocation8 + $0x10] sm:$0xff]  ;;  %v323_v34 = vld [vmem:[#allocation8 + $0x20] sm:$0xff]  ;;  %v324_v35 = vld [vmem:[#allocation8 + $0x28] sm:$0xff] }
  0x60   :  { %v660_v33 = vpack.c.bf16 %v322_v32, %v321_v31  ;;  %v663_v36 = vpack.c.bf16 %v324_v35, %v323_v34  ;;  %v325_v37 = vld [vmem:[#allocation8 + $0x30] sm:$0xff]  ;;  %v326_v38 = vld [vmem:[#allocation8 + $0x38] sm:$0xff]  ;;  %v436_v62 = vld [vmem:[#allocation10] sm:$0xff] }
  0x61   :  { %658 = vmatpush3.bf16.msra.mxu0 %v657_v30  ;;  %v666_v39 = vpack.c.bf16 %v326_v38, %v325_v37  ;;  %v545_v49 = vld [vmem:[%s1049_s5] ss:$0 sm:$0xff]  ;;  %v437_v63 = vld [vmem:[#allocation10 + $0x8] sm:$0xff]  ;;  %v439_v3 = vld [vmem:[#allocation10 + $0x18] sm:$0xff] }
  0x62   :  { %649 = vmatpush3.bf16.msra.mxu1 %v648_v9  ;;  %659 = vmatprep.subr.bf16.mxu0 %v844_v1  ;;  %v546_v51 = vld [vmem:[%s1050_s6] ss:$0 sm:$0xff]  ;;  %v440_v5 = vld [vmem:[#allocation10 + $0x20] sm:$0xff]  ;;  %v441_v6 = vld [vmem:[#allocation10 + $0x28] sm:$0xff] }
  0x63   :  { %650 = vmatprep.subr.bf16.mxu1 %v844_v1  ;;  %v547_v55 = vld [vmem:[%s1052_s8] ss:$0 sm:$0xff]  ;;  %v675_v7 = vpack.c.bf16 %v441_v6, %v440_v5  ;;  %v443_v9 = vld [vmem:[#allocation10 + $0x38] sm:$0xff] }
  0x64   :  { %v438_v2 = vld [vmem:[#allocation10 + $0x10] sm:$0xff] }
  0x65   :  { %661 = vmatpush3.bf16.msra.mxu0 %v660_v33  ;;  %v672_v4 = vpack.c.bf16 %v439_v3, %v438_v2  ;;  %v442_v8 = vld [vmem:[#allocation10 + $0x30] sm:$0xff] }
  0x66   :  { %652 = vmatpush3.bf16.msra.mxu1 %v651_v12  ;;  %662 = vmatprep.subr.bf16.mxu0 %v844_v1  ;;  %v678_v10 = vpack.c.bf16 %v443_v9, %v442_v8 }
  0x67   :  { %653 = vmatprep.subr.bf16.mxu1 %v844_v1 }
  0x69   :  { %664 = vmatpush3.bf16.msra.mxu0 %v663_v36 }
  0x6a   :  { %655 = vmatpush3.bf16.msra.mxu1 %v654_v15  ;;  %665 = vmatprep.subr.bf16.mxu0 %v844_v1 }
  0x6b   :  { %668 = vmatprep.subr.bf16.mxu1 %v844_v1 }
  0x6d   :  { %667 = vmatpush3.bf16.msra.mxu0 %v666_v39 }
 0x130   :  { %v195_v17 = vpop.f32.mrb[0].mxu0 }
 0x131   :  { %v196_v18 = vadd.f32 %v541_v16, %v195_v17  ;;  %v586_v19 = vpop.f32.mrb[1].mxu0 }
 0x133   :  { %v199_v20 = vmax.f32 %v196_v18, 0.0 }
 0x135   :  { %604 = vmatmul.mubr.msk.f32.vlgmr.msra.gmra.mrb[0].mxu1 %vm214_vm2, %v199_v20  ;;  %v549_v20 = vld [vmem:[%s1053_s9] ss:$0 sm:$0xff]  ;;  %s805_s9 = scalar_lea.vmem %s531_s27, 128 }
 0x136   :  { %641 = vmatprep.mubr.msk.f32.mxu1 %vm843_vm0, %v842_v0  ;;  %v669_v0 = vpack.c.bf16 %v437_v63, %v436_v62  ;;  %p806_p12 = scmp.ne.s32.totalorder %s531_s27, %s805_s9  ;;  %p811_p0 = scmp.lt.s32.totalorder %s805_s9, %s805_s9 }
 0x138   :  { %670 = vmatpush3.bf16.msra.mxu1 %v669_v0  ;;  %p812_p1 = por %p811_p0, %p810_p13 }
 0x139   :  { %671 = vmatprep.subr.bf16.mxu1 %v844_v1 }
 0x13a   :  { %p813_p2 = pnand %p812_p1, %p806_p12 }
 0x13c   :  { %673 = vmatpush3.bf16.msra.mxu1 %v672_v4 }
 0x13d   :  { %674 = vmatprep.subr.bf16.mxu1 %v844_v1 }
 0x140   :  { %676 = vmatpush3.bf16.msra.mxu1 %v675_v7 }
 0x141   :  { %677 = vmatprep.subr.bf16.mxu1 %v844_v1  ;;  %v550_v1 = vld [vmem:[%s1054_s10] ss:$0 sm:$0xff] }
 0x144   :  { %679 = vmatpush3.bf16.msra.mxu1 %v678_v10 }
 0x208   :  { %v284_v22 = vpop.f32.mrb[0].mxu1 }
 0x209   :  { %v285_v23 = vadd.f32 %v543_v21, %v284_v22  ;;  %v605_v24 = vpop.f32.mrb[1].mxu1 }
 0x20b   :  { %v288_v25 = vsel %vm214_vm2, %v285_v23, 0.0  ;;  %v293_v26 = vmul.f32 %v285_v23, %v285_v23 }
 0x20c   :  { %289 = vadd.xlane.f32.xlu0 %v288_v25  ;;  %v551_v25 = vld [vmem:[%s1056_s12] ss:$0 sm:$0xff] }
 0x20d   :  { %v294_v27 = vsel %vm214_vm2, %v293_v26, 0.0 }
 0x210   :  { %295 = vadd.xlane.f32.xlu0 %v294_v27 }
 0x299   :  { %v290_v40 = vpop.xlane.xlu0 %289 }
 0x29a   :  { %v292_v41 = vmul.f32 0.015625, %v290_v40 }
 0x29c   :  { %v298_v43 = vmul.f32 %v292_v41, %v292_v41  ;;  %v302_v47 = vsub.f32 %v285_v23, %v292_v41 }
 0x29d   :  { %v296_v42 = vpop.xlane.xlu0 %295 }
 0x29e   :  { %v297_v44 = vmul.f32 0.015625, %v296_v42 }
 0x2a0   :  { %v299_v45 = vsub.f32 %v297_v44, %v298_v43 }
 0x2a2   :  { %v300_v46 = vadd.f32 1e-05, %v299_v45 }
 0x2a4   :  { %691 = vrsqrt.f32 %v300_v46 }
 0x2ae   :  { %v692_v48 = vpop.eup %691 }
 0x2af   :  { %v303_v50 = vmul.f32 %v692_v48, %v302_v47 }
 0x2b1   :  { %v310_v52 = vmul.f32 %v545_v49, %v303_v50 }
 0x2b3   :  { %v317_v53 = vadd.f32 %v546_v51, %v310_v52 }
 0x2b5   :  { %v318_v54 = vmax.f32 %v317_v53, 0.0 }
 0x2b7   :  { %623 = vmatmul.mubr.msk.f32.vlgmr.msra.gmra.mrb[2].mxu0 %vm214_vm2, %v318_v54 }
 0x38a   :  { %v402_v56 = vpop.f32.mrb[2].mxu0 }
 0x38b   :  { %v403_v57 = vadd.f32 %v547_v55, %v402_v56  ;;  %v624_v58 = vpop.f32.mrb[3].mxu0 }
 0x38d   :  { %v406_v59 = vsel %vm214_vm2, %v403_v57, 0.0  ;;  %v410_v60 = vmul.f32 %v403_v57, %v403_v57 }
 0x38e   :  { %407 = vadd.xlane.f32.xlu1 %v406_v59 }
 0x38f   :  { %v411_v61 = vsel %vm214_vm2, %v410_v60, 0.0 }
 0x392   :  { %412 = vadd.xlane.f32.xlu1 %v411_v61 }
 0x41b   :  { %v408_v11 = vpop.xlane.xlu1 %407 }
 0x41c   :  { %v409_v12 = vmul.f32 0.015625, %v408_v11 }
 0x41e   :  { %v415_v14 = vmul.f32 %v409_v12, %v409_v12  ;;  %v419_v18 = vsub.f32 %v403_v57, %v409_v12 }
 0x41f   :  { %v413_v13 = vpop.xlane.xlu1 %412 }
 0x420   :  { %v414_v15 = vmul.f32 0.015625, %v413_v13 }
 0x422   :  { %v416_v16 = vsub.f32 %v414_v15, %v415_v14 }
 0x424   :  { %v417_v17 = vadd.f32 1e-05, %v416_v16 }
 0x426   :  { %693 = vrsqrt.f32 %v417_v17 }
 0x430   :  { %v694_v19 = vpop.eup %693 }
 0x431   :  { %v420_v21 = vmul.f32 %v694_v19, %v419_v18 }
 0x433   :  { %v427_v22 = vmul.f32 %v549_v20, %v420_v21 }
 0x435   :  { %v434_v23 = vadd.f32 %v550_v1, %v427_v22 }
 0x437   :  { %v435_v24 = vmax.f32 %v434_v23, 0.0 }
 0x439   :  { %642 = vmatmul.mubr.msk.f32.vlgmr.msra.gmra.mrb[2].mxu1 %vm214_vm2, %v435_v24 }
 0x50c   :  { %v519_v26 = vpop.f32.mrb[2].mxu1 }
 0x50d   :  { %v520_v27 = vadd.f32 %v551_v25, %v519_v26  ;;  %v643_v28 = vpop.f32.mrb[3].mxu1 }
 0x50f   :  { %523 = vst [vmem:[#allocation11] sm:$0xff] %v520_v27 }
 0x510   :  { %816 = shalt.err (!%p813_p2)
}
 0x511   :  { %s817_s7 = scalar_lea.hbm %s1057_s13, 128 }
 0x512   :  { %p818_p3 = scmp.ne.s32.totalorder %s1057_s13, %s817_s7  ;;  %p821_p4 = scmp.lt.u32.totalorder %s817_s7, %s1057_s13 }
 0x514   :  { %p823_p5 = pnand %p821_p4, %p818_p3 }
 0x516   :  { %826 = shalt.err (!%p823_p5)
}
 0x517   :  { %533 = dma.vmem_to_hbm [thread:$0]  %s531_s27, 128, %s1057_s13, [#allocation4]  }
 0x518   :  { %833 = dma.done.wait [#allocation4], 128  }
 0x519   :  { %834 = vsyncadd [#allocation4], 4294967168 }
 0x51a   :  { %537 = vsyncpa [#allocation3], 1 }
 0x51b   :  { %538 = vsyncpa [#allocation6], 1 }
 0x51c   :  { %539 = vsyncpa [#allocation9], 1 }
 0x51d   :  { %540 = vsyncpa [#allocation4], 1 }

</bundles_post_ra>
